<compile_context>
chip_gen: v6e
topology: v6e:2x2x1
jax: 0.10.0
libtpu: 0.0.40
codegen_flags: <defaults>
</compile_context>

<pallas_src>
import math
import functools

import jax
import jax.numpy as jnp
import numpy as np
from jax.experimental import pallas as pl
from jax.experimental.pallas import tpu as pltpu


def qmt_kernel(x_ref,
               wqkv_ref, bqkv_ref,
               wo_ref, bo_ref,
               wfc_ref, bfc_ref,
               out_ref, *, hidden_pad, cohomology_dim, approx_recip):
    Hp = hidden_pad
    C = cohomology_dim
    BB, S, _ = x_ref.shape
    cd = wqkv_ref.dtype                       # matmul-input dtype (f32 or bf16)

    x2 = x_ref[...].reshape(BB * S, Hp)       # dense-M rows for the projections

    # ---- Fused QKV projection (scale 1/sqrt(head_dim) pre-folded into Q) ----
    qkv = (jnp.dot(x2, wqkv_ref[...], preferred_element_type=jnp.float32)
           + bqkv_ref[...]).reshape(BB, S, 3 * Hp)
    q = qkv[..., :Hp].astype(cd)
    k = qkv[..., Hp:2 * Hp].astype(cd)
    v = qkv[..., 2 * Hp:].astype(cd)

    # ---- Single-head attention (num_heads = 1, module default) ----
    # Contraction on the last dim: no k.T materialization through the XLU.
    scores = jnp.einsum('bqd,bkd->bqk', q, k,
                        preferred_element_type=jnp.float32)          # (BB,S,S)
    m = jnp.max(scores, axis=-1, keepdims=True)
    p = jnp.exp(scores - m)
    denom = jnp.sum(p, axis=-1, keepdims=True)                       # (BB,S,1)
    # TODO(synk): nn.Dropout on attention weights is identity in eval mode;
    # training-mode dropout (random mask) is not implemented.
    ao = jnp.einsum('bqk,bkd->bqd', p.astype(cd), v,
                    preferred_element_type=jnp.float32)              # (BB,S,Hp)
    # Deferred softmax normalization: scale rows of (p @ v) by 1/denom.
    ao = ao * pl.reciprocal(denom, approx=approx_recip)
    # TODO(synk): for large S (>= ~2-4k) this attention block should be tiled
    # flash-style over KV blocks; the full (S,S) scores will not fit v7x VMEM.

    ao2 = ao.reshape(BB * S, Hp).astype(cd)
    ao2 = (jnp.dot(ao2, wo_ref[...], preferred_element_type=jnp.float32)
           + bo_ref[...])                                            # (BB*S,Hp)

    # ---- Fused [field_proj | mean-folded cohomology_proj] projection ----
    fc = (jnp.dot(ao2.astype(cd), wfc_ref[...],
                  preferred_element_type=jnp.float32) + bfc_ref[...])
    field = fc[:, :Hp]                                               # (BB*S,Hp)
    coh_mean = fc[:, Hp:Hp + C]                                      # (BB*S,C)

    scaling = jax.nn.sigmoid(coh_mean)
    # F.linear(scaling, ones(H, C)) == row-sum of scaling broadcast over H.
    scale_sum = jnp.sum(scaling, axis=-1, keepdims=True)             # (BB*S,1)

    out_ref[...] = (field * scale_sum).reshape(BB, S, Hp).astype(out_ref.dtype)


def _round_up(n, m):
    return ((n + m - 1) // m) * m


def _pad2(a, rows, cols):
    return jnp.pad(a, ((0, rows - a.shape[0]), (0, cols - a.shape[1])))


def quantum_motivic_tile(x, params, *, num_heads=1, cohomology_dim=8,
                         motive_rank=4, compute_dtype=jnp.float32,
                         block_batch=None):
    B, S, H = x.shape
    assert num_heads == 1, "kernel implements num_heads=1 (module default)"
    head_dim = H // num_heads
    C, R = cohomology_dim, motive_rank
    wq, bq, wk, bk, wv, bv, wo, bo, wc, bc, wf, bf = params

    # ---------- wrapper-side algebraic folding (exact up to FP order) --------
    scale = 1.0 / math.sqrt(head_dim)
    Hp = _round_up(H, 128)                    # lane-dense hidden dim

    # Fused QKV weight (Hp, 3Hp); zero-padding keeps the math exact.
    wqkv = jnp.concatenate([_pad2(wq * scale, Hp, Hp),
                            _pad2(wk, Hp, Hp),
                            _pad2(wv, Hp, Hp)], axis=1)
    bqkv = jnp.concatenate([_pad2(bq * scale, 1, Hp),
                            _pad2(bk, 1, Hp),
                            _pad2(bv, 1, Hp)], axis=1)
    wo_p, bo_p = _pad2(wo, Hp, Hp), _pad2(bo, 1, Hp)

    # Fold the motive_rank mean (R-major / C-minor blocks) into Wc, then fuse
    # with the field projection into one (Hp, Hp + C) matmul.
    wc_m = wc.reshape(H, R, C).mean(axis=1)                          # (H, C)
    bc_m = bc.reshape(1, R, C).mean(axis=1)                          # (1, C)
    wfc = jnp.concatenate([_pad2(wf, Hp, Hp), _pad2(wc_m, Hp, C)], axis=1)
    bfc = jnp.concatenate([_pad2(bf, 1, Hp), bc_m], axis=1)

    x_p = jnp.pad(x, ((0, 0), (0, 0), (0, Hp - H)))

    # Matmul-input dtype (bf16 on v6e/v7x for MXU throughput); biases and all
    # softmax/sigmoid math stay f32, accumulation is f32.
    cd = np.dtype(compute_dtype)
    x_p = x_p.astype(cd)
    wqkv, wo_p, wfc = wqkv.astype(cd), wo_p.astype(cd), wfc.astype(cd)
    bqkv = bqkv.astype(jnp.float32)
    bo_p = bo_p.astype(jnp.float32)
    bfc = bfc.astype(jnp.float32)

    # Batches per grid step: aim for >= 256 projection rows to fill the MXU M
    # dimension and amortize per-grid-step overhead.
    if block_batch is None:
        bb = min(B, max(1, -(-256 // S)))
        while B % bb:
            bb -= 1
        block_batch = bb
    BB = block_batch
    assert B % BB == 0

    kernel = functools.partial(
        qmt_kernel, hidden_pad=Hp, cohomology_dim=C,
        approx_recip=bool(cd != np.dtype(np.float32)))

    def wspec(shape):
        return pl.BlockSpec(shape, lambda b: (0, 0))

    out = pl.pallas_call(
        kernel,
        out_shape=jax.ShapeDtypeStruct((B, S, Hp), jnp.float32),
        grid=(B // BB,),
        in_specs=[
            pl.BlockSpec((BB, S, Hp), lambda b: (b, 0, 0)),   # x
            wspec((Hp, 3 * Hp)), wspec((1, 3 * Hp)),          # fused QKV
            wspec((Hp, Hp)), wspec((1, Hp)),                  # output proj
            wspec((Hp, Hp + C)), wspec((1, Hp + C)),          # fused field|coh
        ],
        out_specs=pl.BlockSpec((BB, S, Hp), lambda b: (b, 0, 0)),
        compiler_params=pltpu.CompilerParams(
            dimension_semantics=("parallel",),
            # Explicit VMEM budget (double-buffered weights + slabs); sized
            # for v7x's 64 MiB physical VMEM (default scoped limit is lower).
            vmem_limit_bytes=64 * 1024 * 1024),
    )(x_p, wqkv, bqkv, wo_p, bo_p, wfc, bfc)

    return out[..., :H]


def reference(x, params, *, cohomology_dim=8, motive_rank=4):
    """Pure-JAX reference mirroring the PyTorch forward (eval mode)."""
    B, S, H = x.shape
    wq, bq, wk, bk, wv, bv, wo, bo, wc, bc, wf, bf = params
    q = x @ wq + bq
    k = x @ wk + bk
    v = x @ wv + bv
    scores = jnp.einsum('bqd,bkd->bqk', q, k) / math.sqrt(H)
    attn = jax.nn.softmax(scores, axis=-1)
    ao = jnp.einsum('bqk,bkd->bqd', attn, v)
    ao = ao @ wo + bo
    coh = (ao @ wc + bc).reshape(B * S, motive_rank, cohomology_dim)
    field = (ao @ wf + bf).reshape(B * S, H)
    scaling = jax.nn.sigmoid(coh.mean(axis=1))                   # (B*S, C)
    scaling = scaling @ jnp.ones((cohomology_dim, H), jnp.float32)
    return (field * scaling).reshape(B, S, H)


def init_params(key, hidden_dim, cohomology_dim, motive_rank):
    """Deterministic synthetic parameters; weights stored as (in, out)."""
    H, CR = hidden_dim, cohomology_dim * motive_rank
    ks = jax.random.split(key, 12)

    def lin(kw, kb, din, dout):
        bound = 1.0 / math.sqrt(din)
        w = jax.random.uniform(kw, (din, dout), jnp.float32, -bound, bound)
        b = jax.random.uniform(kb, (1, dout), jnp.float32, -bound, bound)
        return w, b

    wq, bq = lin(ks[0], ks[1], H, H)
    wk, bk = lin(ks[2], ks[3], H, H)
    wv, bv = lin(ks[4], ks[5], H, H)
    wo, bo = lin(ks[6], ks[7], H, H)
    wc, bc = lin(ks[8], ks[9], H, CR)
    wf, bf = lin(ks[10], ks[11], H, H)
    return (wq, bq, wk, bk, wv, bv, wo, bo, wc, bc, wf, bf)


if __name__ == "__main__":
    B, S, H = 2, 8, 32
    C, R = 8, 4

    key = jax.random.PRNGKey(0)
    kx, kp = jax.random.split(key)
    x = jax.random.normal(kx, (B, S, H), jnp.float32)
    params = init_params(kp, H, C, R)

    ref = reference(x, params, cohomology_dim=C, motive_rank=R)

    # f32 path (tight check against the reference).
    out = quantum_motivic_tile(x, params, num_heads=1,
                               cohomology_dim=C, motive_rank=R)
    out = jax.block_until_ready(out)
    np.testing.assert_allclose(np.asarray(out), np.asarray(ref),
                               rtol=2e-5, atol=2e-5)

    # bf16 matmul-input path (v6e/v7x MXU throughput), f32 accumulation.
    out_bf16 = quantum_motivic_tile(x, params, num_heads=1,
                                    cohomology_dim=C, motive_rank=R,
                                    compute_dtype=jnp.bfloat16)
    out_bf16 = jax.block_until_ready(out_bf16)
    np.testing.assert_allclose(np.asarray(out_bf16), np.asarray(ref),
                               rtol=5e-2, atol=1e-1)

    print("KERNEL_OK")
</pallas_src>

<mosaic_0001>
module attributes {stable_mosaic.version = 11 : i64} {
  func.func @qmt_kernel(%arg0: i32, %arg1: memref<2x8x128xf32, #tpu.memory_space<vmem>>, %arg2: memref<128x384xf32, #tpu.memory_space<vmem>>, %arg3: memref<1x384xf32, #tpu.memory_space<vmem>>, %arg4: memref<128x128xf32, #tpu.memory_space<vmem>>, %arg5: memref<1x128xf32, #tpu.memory_space<vmem>>, %arg6: memref<128x136xf32, #tpu.memory_space<vmem>>, %arg7: memref<1x136xf32, #tpu.memory_space<vmem>>, %arg8: memref<2x8x128xf32, #tpu.memory_space<vmem>>) attributes {dimension_semantics = [#tpu.dimension_semantics<parallel>], iteration_bounds = array<i64: 1>, scalar_prefetch = 0 : i64, scratch_operands = 0 : i64, tpu.core_type = #tpu.core_type<tc>, window_params = [{transform_indices = @transform_0, window_bounds = array<i64: 2, 8, 128>}, {pipeline_mode = #tpu.pipeline_mode<synchronous>, transform_indices = @transform_1, window_bounds = array<i64: 128, 384>}, {pipeline_mode = #tpu.pipeline_mode<synchronous>, transform_indices = @transform_2, window_bounds = array<i64: 1, 384>}, {pipeline_mode = #tpu.pipeline_mode<synchronous>, transform_indices = @transform_3, window_bounds = array<i64: 128, 128>}, {pipeline_mode = #tpu.pipeline_mode<synchronous>, transform_indices = @transform_4, window_bounds = array<i64: 1, 128>}, {pipeline_mode = #tpu.pipeline_mode<synchronous>, transform_indices = @transform_5, window_bounds = array<i64: 128, 136>}, {pipeline_mode = #tpu.pipeline_mode<synchronous>, transform_indices = @transform_6, window_bounds = array<i64: 1, 136>}, {transform_indices = @transform_7, window_bounds = array<i64: 2, 8, 128>}]} {
    %c0 = arith.constant 0 : index
    %c0_0 = arith.constant 0 : index
    %c0_1 = arith.constant 0 : index
    %0 = vector.load %arg1[%c0, %c0_0, %c0_1] : memref<2x8x128xf32, #tpu.memory_space<vmem>>, vector<2x8x128xf32>
    %1 = vector.shape_cast %0 : vector<2x8x128xf32> to vector<16x128xf32>
    %c0_2 = arith.constant 0 : index
    %c0_3 = arith.constant 0 : index
    %2 = vector.load %arg2[%c0_2, %c0_3] : memref<128x384xf32, #tpu.memory_space<vmem>>, vector<128x384xf32>
    %cst = arith.constant dense<0.000000e+00> : vector<16x384xf32>
    %3 = tpu.matmul %1, %2, %cst {dimension_numbers = #tpu.dot_dimension_numbers<[1], [0], [0], [1], [0, 0, 1, 1], [], []>} : vector<16x128xf32>, vector<128x384xf32>, vector<16x384xf32> -> vector<16x384xf32>
    %c0_4 = arith.constant 0 : index
    %c0_5 = arith.constant 0 : index
    %4 = vector.load %arg3[%c0_4, %c0_5] : memref<1x384xf32, #tpu.memory_space<vmem>>, vector<1x384xf32>
    %5 = vector.broadcast %4 : vector<1x384xf32> to vector<16x384xf32>
    %6 = arith.addf %3, %5 : vector<16x384xf32>
    %7 = vector.shape_cast %6 : vector<16x384xf32> to vector<2x8x384xf32>
    %8 = vector.extract_strided_slice %7 {offsets = [0, 0, 0], sizes = [2, 8, 128], strides = [1, 1, 1]} : vector<2x8x384xf32> to vector<2x8x128xf32>
    %9 = vector.extract_strided_slice %7 {offsets = [0, 0, 128], sizes = [2, 8, 128], strides = [1, 1, 1]} : vector<2x8x384xf32> to vector<2x8x128xf32>
    %10 = vector.extract_strided_slice %7 {offsets = [0, 0, 256], sizes = [2, 8, 128], strides = [1, 1, 1]} : vector<2x8x384xf32> to vector<2x8x128xf32>
    "tpu.trace_start"() <{level = 10 : i32, message = "bqd,bkd->bqk"}> : () -> ()
    %cst_6 = arith.constant dense<0.000000e+00> : vector<2x8x8xf32>
    %11 = tpu.matmul %8, %9, %cst_6 {dimension_numbers = #tpu.dot_dimension_numbers<[2], [2], [1], [1], [0, 0, 0, 1, 1, 1], [0], [0]>} : vector<2x8x128xf32>, vector<2x8x128xf32>, vector<2x8x8xf32> -> vector<2x8x8xf32>
    "tpu.trace_stop"() : () -> ()
    %cst_7 = arith.constant dense<0xFF800000> : vector<2x8xf32>
    %12 = vector.multi_reduction <maximumf>, %11, %cst_7 [2] : vector<2x8x8xf32> to vector<2x8xf32>
    %13 = vector.shape_cast %12 : vector<2x8xf32> to vector<2x8x1xf32>
    %14 = vector.broadcast %13 : vector<2x8x1xf32> to vector<2x8x8xf32>
    %15 = arith.subf %11, %14 : vector<2x8x8xf32>
    %16 = math.exp %15 : vector<2x8x8xf32>
    %cst_8 = arith.constant dense<0.000000e+00> : vector<2x8xf32>
    %17 = vector.multi_reduction <add>, %16, %cst_8 [2] : vector<2x8x8xf32> to vector<2x8xf32>
    %18 = vector.shape_cast %17 : vector<2x8xf32> to vector<2x8x1xf32>
    "tpu.trace_start"() <{level = 10 : i32, message = "bqk,bkd->bqd"}> : () -> ()
    %cst_9 = arith.constant dense<0.000000e+00> : vector<2x8x128xf32>
    %19 = tpu.matmul %16, %10, %cst_9 {dimension_numbers = #tpu.dot_dimension_numbers<[2], [1], [1], [2], [0, 0, 0, 1, 1, 2], [0], [0]>} : vector<2x8x8xf32>, vector<2x8x128xf32>, vector<2x8x128xf32> -> vector<2x8x128xf32>
    "tpu.trace_stop"() : () -> ()
    %20 = tpu.reciprocal %18 : vector<2x8x1xf32> -> vector<2x8x1xf32>
    %21 = vector.broadcast %20 : vector<2x8x1xf32> to vector<2x8x128xf32>
    %22 = arith.mulf %19, %21 : vector<2x8x128xf32>
    %23 = vector.shape_cast %22 : vector<2x8x128xf32> to vector<16x128xf32>
    %c0_10 = arith.constant 0 : index
    %c0_11 = arith.constant 0 : index
    %24 = vector.load %arg4[%c0_10, %c0_11] : memref<128x128xf32, #tpu.memory_space<vmem>>, vector<128x128xf32>
    %cst_12 = arith.constant dense<0.000000e+00> : vector<16x128xf32>
    %25 = tpu.matmul %23, %24, %cst_12 {dimension_numbers = #tpu.dot_dimension_numbers<[1], [0], [0], [1], [0, 0, 1, 1], [], []>} : vector<16x128xf32>, vector<128x128xf32>, vector<16x128xf32> -> vector<16x128xf32>
    %c0_13 = arith.constant 0 : index
    %c0_14 = arith.constant 0 : index
    %26 = vector.load %arg5[%c0_13, %c0_14] : memref<1x128xf32, #tpu.memory_space<vmem>>, vector<1x128xf32>
    %27 = vector.broadcast %26 : vector<1x128xf32> to vector<16x128xf32>
    %28 = arith.addf %25, %27 : vector<16x128xf32>
    %c0_15 = arith.constant 0 : index
    %c0_16 = arith.constant 0 : index
    %29 = vector.load %arg6[%c0_15, %c0_16] : memref<128x136xf32, #tpu.memory_space<vmem>>, vector<128x136xf32>
    %cst_17 = arith.constant dense<0.000000e+00> : vector<16x136xf32>
    %30 = tpu.matmul %28, %29, %cst_17 {dimension_numbers = #tpu.dot_dimension_numbers<[1], [0], [0], [1], [0, 0, 1, 1], [], []>} : vector<16x128xf32>, vector<128x136xf32>, vector<16x136xf32> -> vector<16x136xf32>
    %c0_18 = arith.constant 0 : index
    %c0_19 = arith.constant 0 : index
    %31 = vector.load %arg7[%c0_18, %c0_19] : memref<1x136xf32, #tpu.memory_space<vmem>>, vector<1x136xf32>
    %32 = vector.broadcast %31 : vector<1x136xf32> to vector<16x136xf32>
    %33 = arith.addf %30, %32 : vector<16x136xf32>
    %34 = vector.extract_strided_slice %33 {offsets = [0, 0], sizes = [16, 128], strides = [1, 1]} : vector<16x136xf32> to vector<16x128xf32>
    %35 = vector.extract_strided_slice %33 {offsets = [0, 128], sizes = [16, 8], strides = [1, 1]} : vector<16x136xf32> to vector<16x8xf32>
    %36 = arith.negf %35 : vector<16x8xf32>
    %37 = math.exp %36 : vector<16x8xf32>
    %cst_20 = arith.constant 1.000000e+00 : f32
    %38 = vector.broadcast %cst_20 : f32 to vector<16x8xf32>
    %39 = arith.addf %38, %37 : vector<16x8xf32>
    %40 = arith.divf %38, %39 : vector<16x8xf32>
    %cst_21 = arith.constant dense<0.000000e+00> : vector<16xf32>
    %41 = vector.multi_reduction <add>, %40, %cst_21 [1] : vector<16x8xf32> to vector<16xf32>
    %42 = vector.shape_cast %41 : vector<16xf32> to vector<16x1xf32>
    %43 = vector.broadcast %42 : vector<16x1xf32> to vector<16x128xf32>
    %44 = arith.mulf %34, %43 : vector<16x128xf32>
    %45 = vector.shape_cast %44 : vector<16x128xf32> to vector<2x8x128xf32>
    %c0_22 = arith.constant 0 : index
    %c0_23 = arith.constant 0 : index
    %c0_24 = arith.constant 0 : index
    %46 = vector.load %arg8[%c0_22, %c0_23, %c0_24] : memref<2x8x128xf32, #tpu.memory_space<vmem>>, vector<2x8x128xf32>
    tpu.vector_store %arg8[%c0_22, %c0_23, %c0_24], %45 {strides = array<i32>} : memref<2x8x128xf32, #tpu.memory_space<vmem>>, vector<2x8x128xf32>,
    return
  }
  func.func @transform_0(%arg0: i32) -> (i32, i32, i32) {
    %c0_i32 = arith.constant 0 : i32
    %c0_i32_0 = arith.constant 0 : i32
    %c0_i32_1 = arith.constant 0 : i32
    return %arg0, %c0_i32, %c0_i32_0 : i32, i32, i32
  }
  func.func @transform_1(%arg0: i32) -> (i32, i32) {
    %c0_i32 = arith.constant 0 : i32
    %c0_i32_0 = arith.constant 0 : i32
    %c0_i32_1 = arith.constant 0 : i32
    return %c0_i32, %c0_i32_0 : i32, i32
  }
  func.func @transform_2(%arg0: i32) -> (i32, i32) {
    %c0_i32 = arith.constant 0 : i32
    %c0_i32_0 = arith.constant 0 : i32
    %c0_i32_1 = arith.constant 0 : i32
    return %c0_i32, %c0_i32_0 : i32, i32
  }
  func.func @transform_3(%arg0: i32) -> (i32, i32) {
    %c0_i32 = arith.constant 0 : i32
    %c0_i32_0 = arith.constant 0 : i32
    %c0_i32_1 = arith.constant 0 : i32
    return %c0_i32, %c0_i32_0 : i32, i32
  }
  func.func @transform_4(%arg0: i32) -> (i32, i32) {
    %c0_i32 = arith.constant 0 : i32
    %c0_i32_0 = arith.constant 0 : i32
    %c0_i32_1 = arith.constant 0 : i32
    return %c0_i32, %c0_i32_0 : i32, i32
  }
  func.func @transform_5(%arg0: i32) -> (i32, i32) {
    %c0_i32 = arith.constant 0 : i32
    %c0_i32_0 = arith.constant 0 : i32
    %c0_i32_1 = arith.constant 0 : i32
    return %c0_i32, %c0_i32_0 : i32, i32
  }
  func.func @transform_6(%arg0: i32) -> (i32, i32) {
    %c0_i32 = arith.constant 0 : i32
    %c0_i32_0 = arith.constant 0 : i32
    %c0_i32_1 = arith.constant 0 : i32
    return %c0_i32, %c0_i32_0 : i32, i32
  }
  func.func @transform_7(%arg0: i32) -> (i32, i32, i32) {
    %c0_i32 = arith.constant 0 : i32
    %c0_i32_0 = arith.constant 0 : i32
    %c0_i32_1 = arith.constant 0 : i32
    return %arg0, %c0_i32, %c0_i32_0 : i32, i32, i32
  }
}

</mosaic_0001>

<bundles_post_ra>
// kernel: tpu_custom_call.1
= control target key start
LH: loop header
LB: loop body
LE: loop exit
PB: predicated region body
PF: predicated region fallthrough
CT: control target
= control target key end

     0   :  { %12 = vsyncpa [#allocation3], 0  ;;  %s1425_s0 = inlined_call_operand.hbm [shape: f32[2,8,128], index: 0, kind: input, shape index: {}]   ;;  %s1426_s1 = inlined_call_operand.vmem [shape: f32[128,384], index: 1, kind: input, shape index: {}]   ;;  %s1427_s2 = inlined_call_operand.vmem [shape: f32[1,384], index: 2, kind: input, shape index: {}]   ;;  %s1428_s3 = inlined_call_operand.hbm [shape: f32[128,128], index: 3, kind: input, shape index: {}]   ;;  %s1429_s4 = inlined_call_operand.vmem [shape: f32[1,128], index: 4, kind: input, shape index: {}]   ;;  %s1430_s5 = inlined_call_operand.vmem [shape: f32[128,136], index: 5, kind: input, shape index: {}]   ;;  %s1431_s6 = inlined_call_operand.vmem [shape: f32[1,136], index: 6, kind: input, shape index: {}]   ;;  %s1432_s7 = inlined_call_operand.hbm [shape: f32[2,8,128], index: 7, kind: output, shape index: {}]  }
   0x1   :  { %13 = vsyncpa [#allocation6], 0 }
   0x2   :  { %14 = vsyncpa [#allocation4], 0  ;;  %s1070_s24 = smov [#allocation2]  }
   0x3   :  { %s20_s25 = sshll.u32 %s1070_s24, 4  ;;  %s21_s25 = int_to_ptr.vmem [resolvable:$true] %s20_s25 }
   0x4   :  { %s1012_s26 = scalar_lea.vmem %s21_s25, 256  ;;  %p1017_p1 = scmp.lt.s32.totalorder %s21_s25, %s21_s25 }
   0x5   :  { %p1013_p0 = scmp.ne.s32.totalorder %s21_s25, %s1012_s26  ;;  %p1018_p2 = scmp.lt.s32.totalorder %s1012_s26, %s1012_s26 }
   0x7   :  { %p1019_p3 = por %p1018_p2, %p1017_p1 }
   0x9   :  { %p1020_p4 = pnand %p1019_p3, %p1013_p0 }
   0xb   :  { %1023 = shalt.err (!%p1020_p4)
}
   0xc   :  { %s1071_s27 = smov 128   ;;  %s1072_s28 = smov 8  }
   0xd   :  { %26 = dma.hbm_to_vmem [thread:$0]  %s1425_s0, 256, %s21_s25, [#allocation3], %s1071_s27, %s1071_s27, %s1072_s28  }
   0xe   :  { %s1073_s8 = smov [#allocation5]  }
   0xf   :  { %s36_s9 = sshll.u32 %s1073_s8, 4  ;;  %s37_s9 = int_to_ptr.vmem [resolvable:$true] %s36_s9 }
  0x10   :  { %s1032_s10 = scalar_lea.vmem %s37_s9, 2048  ;;  %p1037_p6 = scmp.lt.s32.totalorder %s37_s9, %s37_s9 }
  0x11   :  { %p1033_p5 = scmp.ne.s32.totalorder %s37_s9, %s1032_s10  ;;  %p1038_p7 = scmp.lt.s32.totalorder %s1032_s10, %s1032_s10 }
  0x13   :  { %p1039_p8 = por %p1038_p7, %p1037_p6 }
  0x15   :  { %p1040_p9 = pnand %p1039_p8, %p1033_p5 }
  0x17   :  { %1043 = shalt.err (!%p1040_p9)
}
  0x18   :  { %42 = dma.hbm_to_vmem [thread:$0]  %s1428_s3, 2048, %s37_s9, [#allocation6], %s1071_s27, %s1071_s27, %s1072_s28  }
  0x19   :  { %1064 = dma.done.wait [#allocation3], 256  }
  0x1a   :  { %1065 = vsyncadd [#allocation3], 4294967040 }
  0x1b   :  { %1066 = dma.done.wait [#allocation6], 2048  }
  0x1c   :  { %1067 = vsyncadd [#allocation6], 4294965248  ;;  %v1074_v0 = vmov 0.0   ;;  %v103_v1 = vld [vmem:[%s1426_s1 + $0x170] sm:$0xff]  ;;  %v102_v2 = vld [vmem:[%s1426_s1 + $0x168] sm:$0xff]  ;;  %v107_v51 = vlaneseq  ;;  %vm1075_vm0 = vmmov 0  }
  0x1d   :  { %186 = vmatprep.mubr.f32.mxu0 %v1074_v0  ;;  %v100_v3 = vld [vmem:[%s1426_s1 + $0x158] sm:$0xff]  ;;  %122 = vmatprep.subr.mxu0 %v103_v1  ;;  %v99_v4 = vld [vmem:[%s1426_s1 + $0x150] sm:$0xff]  ;;  %v97_v5 = vld [vmem:[%s1426_s1 + $0x140] sm:$0xff]  ;;  %vm414_vm1 = vcmask 64512  }
  0x1e   :  { %123 = vmatpush1.msra.mxu0 %v102_v2  ;;  %v96_v6 = vld [vmem:[%s1426_s1 + $0x138] sm:$0xff]  ;;  %v94_v7 = vld [vmem:[%s1426_s1 + $0x128] sm:$0xff]  ;;  %v93_v8 = vld [vmem:[%s1426_s1 + $0x120] sm:$0xff]  ;;  %v1285_v52 = vshrl.u32 %v107_v51, 7 }
  0x1f   :  { %124 = vmatprep.subr.mxu0 %v100_v3  ;;  %v91_v9 = vld [vmem:[%s1426_s1 + $0x110] sm:$0xff]  ;;  %v90_v10 = vld [vmem:[%s1426_s1 + $0x108] sm:$0xff]  ;;  %v88_v11 = vld [vmem:[%s1426_s1 + $0xf8] sm:$0xff] }
  0x20   :  { %125 = vmatpush1.msra.mxu0 %v99_v4  ;;  %v87_v12 = vld [vmem:[%s1426_s1 + $0xf0] sm:$0xff]  ;;  %v85_v13 = vld [vmem:[%s1426_s1 + $0xe0] sm:$0xff]  ;;  %v84_v15 = vld [vmem:[%s1426_s1 + $0xd8] sm:$0xff]  ;;  %v117_v53 = vsub.s32 2, %v1285_v52  ;;  %v113_v56 = vsub.s32 1, %v1285_v52  ;;  %v109_v57 = vsub.s32 0, %v1285_v52 }
  0x21   :  { %126 = vmatprep.subr.mxu0 %v97_v5  ;;  %v1169_v14 = vld [vmem:[#allocation2] sm:$0xff]  ;;  %v104_v16 = vld [vmem:[%s1426_s1 + $0x178] sm:$0xff]  ;;  %v82_v18 = vld [vmem:[%s1426_s1 + $0xc8] sm:$0xff] }
  0x22   :  { %127 = vmatpush1.msra.mxu0 %v96_v6  ;;  %v101_v17 = vld [vmem:[%s1426_s1 + $0x160] sm:$0xff]  ;;  %923 = vmatprep.mubr.f32.mxu1 %v1169_v14  ;;  %v98_v20 = vld [vmem:[%s1426_s1 + $0x148] sm:$0xff]  ;;  %v79_v21 = vld [vmem:[%s1426_s1 + $0xb0] sm:$0xff] }
  0x23   :  { %128 = vmatprep.subr.mxu0 %v94_v7  ;;  %891 = vmatprep.subr.mxu1 %v104_v16  ;;  %v81_v19 = vld [vmem:[%s1426_s1 + $0xc0] sm:$0xff]  ;;  %v78_v22 = vld [vmem:[%s1426_s1 + $0xa8] sm:$0xff]  ;;  %v95_v23 = vld [vmem:[%s1426_s1 + $0x130] sm:$0xff] }
  0x24   :  { %129 = vmatpush1.msra.mxu0 %v93_v8  ;;  %892 = vmatpush3.msra.mxu1 %v104_v16  ;;  %v76_v24 = vld [vmem:[%s1426_s1 + $0x98] sm:$0xff]  ;;  %v75_v25 = vld [vmem:[%s1426_s1 + $0x90] sm:$0xff]  ;;  %v73_v27 = vld [vmem:[%s1426_s1 + $0x80] sm:$0xff] }
  0x25   :  { %130 = vmatprep.subr.mxu0 %v91_v9  ;;  %893 = vmatprep.subr.mxu1 %v101_v17  ;;  %v92_v26 = vld [vmem:[%s1426_s1 + $0x118] sm:$0xff]  ;;  %v89_v29 = vld [vmem:[%s1426_s1 + $0x100] sm:$0xff]  ;;  %v70_v30 = vld [vmem:[%s1426_s1 + $0x68] sm:$0xff] }
  0x26   :  { %131 = vmatpush1.msra.mxu0 %v90_v10  ;;  %894 = vmatpush3.msra.mxu1 %v101_v17  ;;  %v72_v28 = vld [vmem:[%s1426_s1 + $0x78] sm:$0xff]  ;;  %v69_v31 = vld [vmem:[%s1426_s1 + $0x60] sm:$0xff]  ;;  %v86_v32 = vld [vmem:[%s1426_s1 + $0xe8] sm:$0xff] }
  0x27   :  { %132 = vmatprep.subr.mxu0 %v88_v11  ;;  %895 = vmatprep.subr.mxu1 %v98_v20  ;;  %v67_v33 = vld [vmem:[%s1426_s1 + $0x50] sm:$0xff]  ;;  %v66_v34 = vld [vmem:[%s1426_s1 + $0x48] sm:$0xff]  ;;  %v64_v36 = vld [vmem:[%s1426_s1 + $0x38] sm:$0xff] }
  0x28   :  { %133 = vmatpush1.msra.mxu0 %v87_v12  ;;  %896 = vmatpush3.msra.mxu1 %v98_v20  ;;  %v83_v35 = vld [vmem:[%s1426_s1 + $0xd0] sm:$0xff]  ;;  %v80_v38 = vld [vmem:[%s1426_s1 + $0xb8] sm:$0xff]  ;;  %v61_v39 = vld [vmem:[%s1426_s1 + $0x20] sm:$0xff] }
  0x29   :  { %134 = vmatprep.subr.mxu0 %v85_v13  ;;  %897 = vmatprep.subr.mxu1 %v95_v23  ;;  %v63_v37 = vld [vmem:[%s1426_s1 + $0x30] sm:$0xff]  ;;  %v60_v40 = vld [vmem:[%s1426_s1 + $0x18] sm:$0xff]  ;;  %v77_v41 = vld [vmem:[%s1426_s1 + $0xa0] sm:$0xff] }
  0x2a   :  { %135 = vmatpush1.msra.mxu0 %v84_v15  ;;  %898 = vmatpush3.msra.mxu1 %v95_v23  ;;  %v58_v42 = vld [vmem:[%s1426_s1 + $0x8] sm:$0xff]  ;;  %v57_v43 = vld [vmem:[%s1426_s1] sm:$0xff]  ;;  %v71_v45 = vld [vmem:[%s1426_s1 + $0x70] sm:$0xff] }
  0x2b   :  { %136 = vmatprep.subr.mxu0 %v82_v18  ;;  %899 = vmatprep.subr.mxu1 %v92_v26  ;;  %v74_v44 = vld [vmem:[%s1426_s1 + $0x88] sm:$0xff]  ;;  %v68_v46 = vld [vmem:[%s1426_s1 + $0x58] sm:$0xff]  ;;  %v65_v48 = vld [vmem:[%s1426_s1 + $0x40] sm:$0xff] }
  0x2c   :  { %137 = vmatpush1.msra.mxu0 %v81_v19  ;;  %900 = vmatpush3.msra.mxu1 %v92_v26  ;;  %v56_v47 = vld [vmem:[#allocation2 + $0x8] sm:$0xff]  ;;  %v59_v50 = vld [vmem:[%s1426_s1 + $0x10] sm:$0xff]  ;;  %v105_v54 = vld [vmem:[%s1427_s2] sm:$0x7] }
  0x2d   :  { %138 = vmatprep.subr.mxu0 %v79_v21  ;;  %901 = vmatprep.subr.mxu1 %v89_v29  ;;  %v62_v49 = vld [vmem:[%s1426_s1 + $0x28] sm:$0xff]  ;;  %v118_v55 = vrot.slane %v105_v54, %v117_v53  ;;  %v114_v58 = vrot.slane %v105_v54, %v113_v56  ;;  %v110_v60 = vrot.slane %v105_v54, %v109_v57  ;;  %v597_v26 = vld [vmem:[#allocation5 + $0x70] sm:$0xff]  ;;  %v700_v54 = vld [vmem:[%s1430_s5 + $0x98] sm:$0xff] }
  0x2e   :  { %139 = vmatpush1.msra.mxu0 %v78_v22  ;;  %902 = vmatpush3.msra.mxu1 %v89_v29  ;;  %v594_v29 = vld [vmem:[#allocation5 + $0x58] sm:$0xff]  ;;  %v701_v53 = vld [vmem:[%s1430_s5 + $0xa0] sm:$0xff] }
  0x2f   :  { %140 = vmatprep.subr.mxu0 %v76_v24  ;;  %903 = vmatprep.subr.mxu1 %v86_v32  ;;  %v702_v51 = vld [vmem:[%s1430_s5 + $0xa8] sm:$0xff] }
  0x30   :  { %141 = vmatpush1.msra.mxu0 %v75_v25  ;;  %904 = vmatpush3.msra.mxu1 %v86_v32  ;;  %v598_v25 = vld [vmem:[#allocation5 + $0x78] sm:$0xff]  ;;  %v591_v32 = vld [vmem:[#allocation5 + $0x40] sm:$0xff] }
  0x31   :  { %142 = vmatprep.subr.mxu0 %v73_v27  ;;  %905 = vmatprep.subr.mxu1 %v83_v35  ;;  %v596_v27 = vld [vmem:[#allocation5 + $0x68] sm:$0xff] }
  0x32   :  { %143 = vmatpush1.msra.mxu0 %v72_v28  ;;  %906 = vmatpush3.msra.mxu1 %v83_v35  ;;  %v595_v28 = vld [vmem:[#allocation5 + $0x60] sm:$0xff]  ;;  %v588_v35 = vld [vmem:[#allocation5 + $0x28] sm:$0xff] }
  0x33   :  { %144 = vmatprep.subr.mxu0 %v70_v30  ;;  %907 = vmatprep.subr.mxu1 %v80_v38  ;;  %v593_v30 = vld [vmem:[#allocation5 + $0x50] sm:$0xff] }
  0x34   :  { %145 = vmatpush1.msra.mxu0 %v69_v31  ;;  %908 = vmatpush3.msra.mxu1 %v80_v38  ;;  %v592_v31 = vld [vmem:[#allocation5 + $0x48] sm:$0xff]  ;;  %v585_v38 = vld [vmem:[#allocation5 + $0x10] sm:$0xff] }
  0x35   :  { %146 = vmatprep.subr.mxu0 %v67_v33  ;;  %909 = vmatprep.subr.mxu1 %v77_v41  ;;  %v590_v33 = vld [vmem:[#allocation5 + $0x38] sm:$0xff] }
  0x36   :  { %147 = vmatpush1.msra.mxu0 %v66_v34  ;;  %910 = vmatpush3.msra.mxu1 %v77_v41  ;;  %v589_v34 = vld [vmem:[#allocation5 + $0x30] sm:$0xff]  ;;  %v712_v41 = vld [vmem:[%s1430_s5 + $0xf8] sm:$0xff] }
  0x37   :  { %148 = vmatprep.subr.mxu0 %v64_v36  ;;  %911 = vmatprep.subr.mxu1 %v74_v44  ;;  %v587_v36 = vld [vmem:[#allocation5 + $0x20] sm:$0xff] }
  0x38   :  { %149 = vmatpush1.msra.mxu0 %v63_v37  ;;  %912 = vmatpush3.msra.mxu1 %v74_v44  ;;  %v586_v37 = vld [vmem:[#allocation5 + $0x18] sm:$0xff]  ;;  %v709_v44 = vld [vmem:[%s1430_s5 + $0xe0] sm:$0xff] }
  0x39   :  { %150 = vmatprep.subr.mxu0 %v61_v39  ;;  %913 = vmatprep.subr.mxu1 %v71_v45  ;;  %v584_v39 = vld [vmem:[#allocation5 + $0x8] sm:$0xff] }
  0x3a   :  { %151 = vmatpush1.msra.mxu0 %v60_v40  ;;  %914 = vmatpush3.msra.mxu1 %v71_v45  ;;  %v583_v40 = vld [vmem:[#allocation5] sm:$0xff]  ;;  %v708_v45 = vld [vmem:[%s1430_s5 + $0xd8] sm:$0xff] }
  0x3b   :  { %152 = vmatprep.subr.mxu0 %v58_v42  ;;  %915 = vmatprep.subr.mxu1 %v68_v46  ;;  %v711_v42 = vld [vmem:[%s1430_s5 + $0xf0] sm:$0xff] }
  0x3c   :  { %153 = vmatpush1.msra.mxu0 %v57_v43  ;;  %916 = vmatpush3.msra.mxu1 %v68_v46  ;;  %v710_v43 = vld [vmem:[%s1430_s5 + $0xe8] sm:$0xff]  ;;  %v707_v46 = vld [vmem:[%s1430_s5 + $0xd0] sm:$0xff] }
  0x3d   :  { %187 = vmatmul.mubr.f32.vlgmr.msra.gmra.mxu0 %v1169_v14  ;;  %941 = vmatprep.subr.mxu0 %v1074_v0 }
  0x3e   :  { %192 = vmatprep.mubr.f32.mxu0 %v1074_v0  ;;  %917 = vmatprep.subr.mxu1 %v65_v48 }
  0x3f   :  { %918 = vmatpush3.msra.mxu1 %v65_v48  ;;  %v705_v48 = vld [vmem:[%s1430_s5 + $0xc0] sm:$0xff] }
  0x40   :  { %919 = vmatprep.subr.mxu1 %v62_v49 }
  0x41   :  { %193 = vmatmul.mubr.f32.gmra.mxu0 %v56_v47  ;;  %920 = vmatpush3.msra.mxu1 %v62_v49  ;;  %v704_v49 = vld [vmem:[%s1430_s5 + $0xb8] sm:$0xff] }
  0x42   :  { %921 = vmatprep.subr.mxu1 %v59_v50  ;;  %943 = vmatprep.mubr.msk.f32.mxu0 %vm1075_vm0, %v1074_v0 }
  0x43   :  { %922 = vmatpush3.msra.mxu1 %v59_v50  ;;  %v703_v50 = vld [vmem:[%s1430_s5 + $0xb0] sm:$0xff] }
  0x44   :  { %924 = vmatmul.mubr.f32.vlgmr.msra.gmra.mxu1 %v56_v47  ;;  %926 = vmatprep.subr.mxu1 %v1074_v0  ;;  %v706_v47 = vld [vmem:[%s1430_s5 + $0xc8] sm:$0xff] }
  0x45   :  { %928 = vmatprep.mubr.msk.f32.mxu1 %vm1075_vm0, %v1074_v0 }
  0xfd   :  { %v188_v59 = vpop.f32.mrf.mxu0 }
  0xfe   :  { %v189_v1 = vadd.f32 %v188_v59, %v110_v60  ;;  %v697_v59 = vld [vmem:[%s1430_s5 + $0x80] sm:$0xff] }
  0xff   :  { %v190_v61 = vpop.f32.mrf.mxu0 }
 0x100   :  { %v191_v62 = vadd.f32 %v190_v61, %v114_v58  ;;  %v695_v61 = vld [vmem:[%s1430_s5 + $0x70] sm:$0xff] }
 0x101   :  { %v194_v63 = vpop.f32.mrf.mxu0 }
 0x102   :  { %927 = vmatpush3.xpose.msra.mxu1 %v191_v62  ;;  %v195_v4 = vadd.f32 %v194_v63, %v110_v60  ;;  %v696_v60 = vld [vmem:[%s1430_s5 + $0x78] sm:$0xff]  ;;  %v694_v62 = vld [vmem:[%s1430_s5 + $0x68] sm:$0xff]  ;;  %v693_v63 = vld [vmem:[%s1430_s5 + $0x60] sm:$0xff] }
 0x103   :  { %v196_v2 = vpop.f32.mrf.mxu0  ;;  %931 = vmatprep.subr.mxu1 %v1074_v0 }
 0x104   :  { %v197_v3 = vadd.f32 %v196_v2, %v114_v58  ;;  %v925_v5 = vpop.f32.mrf.mxu1  ;;  %v698_v58 = vld [vmem:[%s1430_s5 + $0x88] sm:$0xff]  ;;  %v691_v2 = vld [vmem:[%s1430_s5 + $0x50] sm:$0xff] }
 0x105   :  { %929 = vmatmul.mubr.f32.vlgmr.msra.gmra.mxu1 %v189_v1  ;;  %v271_v6 = vadd.f32 %v925_v5, %v118_v55  ;;  %v692_v1 = vld [vmem:[%s1430_s5 + $0x58] sm:$0xff] }
 0x106   :  { %932 = vmatpush3.xpose.msra.mxu1 %v197_v3  ;;  %933 = vmatprep.mubr.msk.f32.mxu1 %vm1075_vm0, %v1074_v0  ;;  %v265_v7 = vpop.f32.mrf.mxu1  ;;  %v690_v3 = vld [vmem:[%s1430_s5 + $0x48] sm:$0xff]  ;;  %v688_v5 = vld [vmem:[%s1430_s5 + $0x38] sm:$0xff] }
 0x107   :  { %936 = vmatprep.subr.mxu1 %v1074_v0  ;;  %v266_v8 = vadd.f32 %v265_v7, %v118_v55  ;;  %942 = vmatpush3.msra.mxu0 %v271_v6  ;;  %v699_v55 = vld [vmem:[%s1430_s5 + $0x90] sm:$0xff]  ;;  %v686_v7 = vld [vmem:[%s1430_s5 + $0x28] sm:$0xff] }
 0x108   :  { %725 = vmatprep.subr.mxu0 %v712_v41  ;;  %v687_v6 = vld [vmem:[%s1430_s5 + $0x30] sm:$0xff] }
 0x109   :  { %934 = vmatmul.mubr.f32.vlgmr.msra.gmra.mxu1 %v195_v4  ;;  %v689_v4 = vld [vmem:[%s1430_s5 + $0x40] sm:$0xff] }
 0x10a   :  { %938 = vmatprep.mubr.msk.f32.mxu1 %vm1075_vm0, %v1074_v0  ;;  %937 = vmatpush3.msra.mxu1 %v266_v8 }
 0x10b   :  { %946 = vmatprep.subr.mxu1 %v598_v25 }
 0x1c5   :  { %v340_v9 = vpop.f32.mrf.mxu1 }
 0x1c6   :  { %v415_v10 = vsel %vm414_vm1, %v340_v9, -inf }
 0x1c7   :  { %416 = vmax.xlane.f32.xlu0 %v415_v10  ;;  %v930_v11 = vpop.f32.mrf.mxu1 }
 0x1c9   :  { %v410_v12 = vpop.f32.mrf.mxu1 }
 0x1ca   :  { %v418_v13 = vsel %vm414_vm1, %v410_v12, -inf }
 0x1cb   :  { %419 = vmax.xlane.f32.xlu0 %v418_v13  ;;  %v935_v14 = vpop.f32.mrf.mxu1 }
 0x250   :  { %v417_v15 = vpop.xlane.xlu0 %416 }
 0x251   :  { %v421_v16 = vsub.f32 %v340_v9, %v417_v15 }
 0x253   :  { %v423_v17 = vmul.f32 1.442695, %v421_v16 }
 0x254   :  { %v420_v18 = vpop.xlane.xlu0 %419 }
 0x255   :  { %988 = vpow2.f32 %v423_v17  ;;  %v422_v19 = vsub.f32 %v410_v12, %v420_v18  ;;  %v685_v18 = vld [vmem:[%s1430_s5 + $0x20] sm:$0xff] }
 0x257   :  { %v425_v20 = vmul.f32 1.442695, %v422_v19  ;;  %v684_v19 = vld [vmem:[%s1430_s5 + $0x18] sm:$0xff] }
 0x259   :  { %990 = vpow2.f32 %v425_v20  ;;  %v683_v20 = vld [vmem:[%s1430_s5 + $0x10] sm:$0xff] }
 0x262   :  { %v989_v21 = vpop.eup %988 }
 0x263   :  { %939 = vmatmul.mubr.msk.f32.vlgmr.msra.gmra.mxu1 %vm414_vm1, %v989_v21  ;;  %v427_v22 = vsel %vm414_vm1, %v989_v21, 0.0  ;;  %v682_v21 = vld [vmem:[%s1430_s5 + $0x8] sm:$0xff] }
 0x264   :  { %428 = vadd.xlane.f32.xlu1 %v427_v22  ;;  %947 = vmatpush3.msra.mxu1 %v598_v25  ;;  %v681_v22 = vld [vmem:[%s1430_s5] sm:$0xff] }
 0x265   :  { %948 = vmatprep.subr.mxu1 %v597_v26 }
 0x266   :  { %v991_v23 = vpop.eup %990  ;;  %949 = vmatpush3.msra.mxu1 %v597_v26 }
 0x267   :  { %944 = vmatmul.mubr.msk.f32.vlgmr.msra.gmra.mxu0 %vm414_vm1, %v991_v23  ;;  %v430_v24 = vsel %vm414_vm1, %v991_v23, 0.0  ;;  %950 = vmatprep.subr.mxu1 %v596_v27 }
 0x268   :  { %431 = vadd.xlane.f32.xlu1 %v430_v24  ;;  %789 = vmatprep.mubr.f32.mxu0 %v1074_v0  ;;  %v844_v24 = vld [vmem:[%s1429_s4] ss:$0 sm:$0xff]  ;;  %s1076_s4 = smov [#allocation7]  }
 0x269   :  { %951 = vmatpush3.msra.mxu1 %v596_v27  ;;  %726 = vmatpush1.msra.mxu0 %v711_v42  ;;  %s829_s5 = sshll.u32 %s1076_s4, 4  ;;  %s830_s5 = int_to_ptr.vmem [resolvable:$true] %s829_s5 }
 0x26a   :  { %952 = vmatprep.subr.mxu1 %v595_v28  ;;  %727 = vmatprep.subr.mxu0 %v710_v43  ;;  %p1049_p11 = scmp.lt.s32.totalorder %s830_s5, %s830_s5 }
 0x26b   :  { %953 = vmatpush3.msra.mxu1 %v595_v28  ;;  %728 = vmatpush1.msra.mxu0 %v709_v44  ;;  %v713_v28 = vld [vmem:[%s1431_s6] sm:$0x3]  ;;  %s1044_s6 = scalar_lea.vmem %s830_s5, 256 }
 0x26c   :  { %954 = vmatprep.subr.mxu1 %v594_v29  ;;  %729 = vmatprep.subr.mxu0 %v708_v45  ;;  %v718_v44 = vrot.slane %v713_v28, %v109_v57  ;;  %p1045_p10 = scmp.ne.s32.totalorder %s830_s5, %s1044_s6  ;;  %p1050_p12 = scmp.lt.s32.totalorder %s1044_s6, %s1044_s6 }
 0x26d   :  { %955 = vmatpush3.msra.mxu1 %v594_v29  ;;  %730 = vmatpush1.msra.mxu0 %v707_v46  ;;  %v722_v29 = vrot.slane %v713_v28, %v113_v56 }
 0x26e   :  { %956 = vmatprep.subr.mxu1 %v593_v30  ;;  %731 = vmatprep.subr.mxu0 %v706_v47  ;;  %p1051_p13 = por %p1050_p12, %p1049_p11 }
 0x26f   :  { %957 = vmatpush3.msra.mxu1 %v593_v30  ;;  %732 = vmatpush1.msra.mxu0 %v705_v48 }
 0x270   :  { %958 = vmatprep.subr.mxu1 %v592_v31  ;;  %733 = vmatprep.subr.mxu0 %v704_v49  ;;  %p1052_p0 = pnand %p1051_p13, %p1045_p10 }
 0x271   :  { %959 = vmatpush3.msra.mxu1 %v592_v31  ;;  %734 = vmatpush1.msra.mxu0 %v703_v50 }
 0x272   :  { %960 = vmatprep.subr.mxu1 %v591_v32  ;;  %735 = vmatprep.subr.mxu0 %v702_v51 }
 0x273   :  { %961 = vmatpush3.msra.mxu1 %v591_v32  ;;  %736 = vmatpush1.msra.mxu0 %v701_v53 }
 0x274   :  { %962 = vmatprep.subr.mxu1 %v590_v33  ;;  %737 = vmatprep.subr.mxu0 %v700_v54 }
 0x275   :  { %963 = vmatpush3.msra.mxu1 %v590_v33  ;;  %738 = vmatpush1.msra.mxu0 %v699_v55 }
 0x276   :  { %964 = vmatprep.subr.mxu1 %v589_v34  ;;  %739 = vmatprep.subr.mxu0 %v698_v58 }
 0x277   :  { %965 = vmatpush3.msra.mxu1 %v589_v34  ;;  %740 = vmatpush1.msra.mxu0 %v697_v59 }
 0x278   :  { %966 = vmatprep.subr.mxu1 %v588_v35  ;;  %741 = vmatprep.subr.mxu0 %v696_v60 }
 0x279   :  { %967 = vmatpush3.msra.mxu1 %v588_v35  ;;  %742 = vmatpush1.msra.mxu0 %v695_v61 }
 0x27a   :  { %968 = vmatprep.subr.mxu1 %v587_v36  ;;  %743 = vmatprep.subr.mxu0 %v694_v62 }
 0x27b   :  { %969 = vmatpush3.msra.mxu1 %v587_v36  ;;  %744 = vmatpush1.msra.mxu0 %v693_v63 }
 0x27c   :  { %970 = vmatprep.subr.mxu1 %v586_v37  ;;  %745 = vmatprep.subr.mxu0 %v692_v1 }
 0x27d   :  { %971 = vmatpush3.msra.mxu1 %v586_v37  ;;  %746 = vmatpush1.msra.mxu0 %v691_v2 }
 0x27e   :  { %972 = vmatprep.subr.mxu1 %v585_v38  ;;  %747 = vmatprep.subr.mxu0 %v690_v3 }
 0x27f   :  { %973 = vmatpush3.msra.mxu1 %v585_v38  ;;  %748 = vmatpush1.msra.mxu0 %v689_v4 }
 0x280   :  { %974 = vmatprep.subr.mxu1 %v584_v39  ;;  %749 = vmatprep.subr.mxu0 %v688_v5 }
 0x281   :  { %975 = vmatpush3.msra.mxu1 %v584_v39  ;;  %750 = vmatpush1.msra.mxu0 %v687_v6 }
 0x282   :  { %976 = vmatprep.subr.mxu1 %v583_v40  ;;  %751 = vmatprep.subr.mxu0 %v686_v7 }
 0x283   :  { %977 = vmatpush3.msra.mxu1 %v583_v40  ;;  %752 = vmatpush1.msra.mxu0 %v685_v18 }
 0x284   :  { %753 = vmatprep.subr.mxu0 %v684_v19 }
 0x285   :  { %754 = vmatpush1.msra.mxu0 %v683_v20 }
 0x286   :  { %755 = vmatprep.subr.mxu0 %v682_v21 }
 0x287   :  { %756 = vmatpush1.msra.mxu0 %v681_v22 }
 0x2ed   :  { %v429_v8 = vpop.xlane.xlu1 %428 }
 0x2ee   :  { %992 = vrcp.f32 %v429_v8 }
 0x2f1   :  { %v432_v9 = vpop.xlane.xlu1 %431 }
 0x2f2   :  { %994 = vrcp.f32 %v432_v9 }
 0x2fb   :  { %v993_v10 = vpop.eup %992 }
 0x2ff   :  { %v995_v14 = vpop.eup %994 }
 0x323   :  { %v502_v11 = vpop.f32.mrf.mxu1 }
 0x324   :  { %v581_v12 = vmul.f32 %v993_v10, %v502_v11 }
 0x325   :  { %v940_v13 = vpop.f32.mrf.mxu1 }
 0x326   :  { %978 = vmatprep.mubr.f32.mxu1 %v581_v12 }
 0x327   :  { %v575_v15 = vpop.f32.mrf.mxu0 }
 0x328   :  { %v582_v16 = vmul.f32 %v995_v14, %v575_v15 }
 0x329   :  { %v945_v17 = vpop.f32.mrf.mxu0 }
 0x32a   :  { %979 = vmatmul.mubr.f32.vlgmr.msra.gmra.mxu1 %v582_v16 }
 0x3ea   :  { %v980_v23 = vpop.f32.mrf.mxu1 }
 0x3eb   :  { %v678_v27 = vadd.f32 %v980_v23, %v844_v24 }
 0x3ec   :  { %v672_v25 = vpop.f32.mrf.mxu1 }
 0x3ed   :  { %v673_v26 = vadd.f32 %v844_v24, %v672_v25 }
 0x3ef   :  { %790 = vmatmul.mubr.f32.vlgmr.msra.gmra.mxu0 %v673_v26 }
 0x3f0   :  { %795 = vmatprep.mubr.f32.mxu0 %v1074_v0 }
 0x3f3   :  { %796 = vmatmul.mubr.f32.gmra.mxu0 %v678_v27 }
 0x4af   :  { %v791_v30 = vpop.f32.mrf.mxu0 }
 0x4b0   :  { %v792_v45 = vadd.f32 %v791_v30, %v718_v44 }
 0x4b1   :  { %v793_v31 = vpop.f32.mrf.mxu0 }
 0x4b2   :  { %v794_v32 = vadd.f32 %v793_v31, %v722_v29 }
 0x4b3   :  { %v797_v33 = vpop.f32.mrf.mxu0 }
 0x4b4   :  { %v845_v34 = vmul.f32 -1.442695, %v794_v32  ;;  %v798_v48 = vadd.f32 %v797_v33, %v718_v44 }
 0x4b5   :  { %v799_v35 = vpop.f32.mrf.mxu0 }
 0x4b6   :  { %996 = vpow2.f32 %v845_v34  ;;  %v800_v36 = vadd.f32 %v799_v35, %v722_v29 }
 0x4b8   :  { %v846_v37 = vmul.f32 -1.442695, %v800_v36 }
 0x4ba   :  { %998 = vpow2.f32 %v846_v37 }
 0x4c3   :  { %v997_v0 = vpop.eup %996 }
 0x4c4   :  { %v808_v38 = vadd.f32 1.0, %v997_v0 }
 0x4c6   :  { %1000 = vrcp.f32 %v808_v38 }
 0x4c7   :  { %v999_v39 = vpop.eup %998 }
 0x4c8   :  { %v809_v40 = vadd.f32 1.0, %v999_v39 }
 0x4ca   :  { %1002 = vrcp.f32 %v809_v40 }
 0x4d3   :  { %v1001_v41 = vpop.eup %1000 }
 0x4d4   :  { %v814_v42 = vsel %vm414_vm1, %v1001_v41, 0.0 }
 0x4d5   :  { %815 = vadd.xlane.f32.xlu0 %v814_v42 }
 0x4d7   :  { %v1003_v56 = vpop.eup %1002 }
 0x4d8   :  { %v817_v43 = vsel %vm414_vm1, %v1003_v56, 0.0 }
 0x4d9   :  { %818 = vadd.xlane.f32.xlu1 %v817_v43 }
 0x55e   :  { %v816_v46 = vpop.xlane.xlu0 %815 }
 0x55f   :  { %v820_v47 = vmul.f32 %v816_v46, %v792_v45 }
 0x561   :  { %822 = vst [vmem:[#allocation7] sm:$0xff] %v820_v47 }
 0x562   :  { %v819_v49 = vpop.xlane.xlu1 %818 }
 0x563   :  { %v821_v50 = vmul.f32 %v819_v49, %v798_v48 }
 0x565   :  { %823 = vst [vmem:[#allocation7 + $0x8] sm:$0xff] %v821_v50 }
 0x566   :  { %1055 = shalt.err (!%p1052_p0)
}
 0x567   :  { %835 = dma.vmem_to_hbm [thread:$0]  %s830_s5, 256, %s1432_s7, [#allocation4], %s1071_s27, %s1071_s27, %s1072_s28  }
 0x568   :  { %1068 = dma.done.wait [#allocation4], 256  }
 0x569   :  { %1069 = vsyncadd [#allocation4], 4294967040 }
 0x56a   :  { %839 = vsyncpa [#allocation3], 1 }
 0x56b   :  { %840 = vsyncpa [#allocation6], 1 }
 0x56c   :  { %841 = vsyncpa [#allocation4], 1 }

</bundles_post_ra>
